<compile_context>
chip_gen: v5e
topology: v5e:2x2
jax: 0.10.0
libtpu: 0.0.40
codegen_flags: <defaults>
</compile_context>

<pallas_src>
import functools

import jax
import jax.numpy as jnp
import numpy as np
from jax import lax
from jax.experimental import pallas as pl
from jax.experimental.pallas import tpu as pltpu


def _round_up(x, m):
    return ((x + m - 1) // m) * m


def _make_gc_kernel(C, TH, Wo):
    """Kernel for one H tile: (C, TH, W) + (C, 8, W) halo -> (TH, Wo)."""

    def gc_kernel(x_ref, halo_ref, o_ref):
        # x_ref: (C, TH, W); halo_ref: (C, 8, W); o_ref: (TH, Wo).
        # The per-channel Sobel weights are identical (tiled), so the channel
        # sum commutes with the 3x3 spatial filter.
        xs_m = x_ref[0, :, :].astype(jnp.float32)
        xs_h = halo_ref[0, :, :].astype(jnp.float32)
        for c in range(1, C):
            xs_m = xs_m + x_ref[c, :, :].astype(jnp.float32)
            xs_h = xs_h + halo_ref[c, :, :].astype(jnp.float32)
        # Rows [0, TH) are the tile, rows [TH, TH+8) hold the 2 halo rows
        # (remaining halo rows / clamped garbage are never used for valid
        # output rows and partial output blocks are masked on writeback).
        xs = jnp.concatenate([xs_m, xs_h], axis=0)          # (TH + 8, W)

        # Combined filter sobel_x + sobel_y = 2 * [[1,1,0],[1,0,-1],[0,-1,-1]]
        # (zero taps skipped, factor 2 hoisted). Group taps by column offset:
        # row combinations at full width (aligned, cheap), then one
        # lane-shifted slice per column offset.
        a0 = xs[0:TH, :] + xs[1:TH + 1, :]          # col +0: (0,0)+, (1,0)+
        a1 = xs[0:TH, :] - xs[2:TH + 2, :]          # col +1: (0,1)+, (2,1)-
        a2 = -(xs[1:TH + 1, :] + xs[2:TH + 2, :])   # col +2: (1,2)-, (2,2)-
        acc = 2.0 * (a0[:, 0:Wo] + a1[:, 1:Wo + 1] + a2[:, 2:Wo + 2])

        # Tanhshrink: x - tanh(x); tanh runs on the (otherwise idle) EUP.
        o_ref[...] = (acc - jnp.tanh(acc)).astype(o_ref.dtype)

    return gc_kernel


def sobel_tanhshrink(x, *, tile_h=256):
    """Tanhshrink(sobel_x(x) + sobel_y(x)), VALID 3x3, NCHW -> (N,1,H-2,W-2) f32."""
    N, C, H, W = x.shape
    if H < 3 or W < 3:
        raise ValueError("H and W must be >= 3 for a VALID 3x3 convolution")
    Ho, Wo = H - 2, W - 2

    # Tile height: multiple of 8 (sublane rule + 8-row halo alignment),
    # no larger than needed to cover Ho. tile_h ~256 targets v6e/v7x; use
    # ~128 on v5e if not raising the VMEM limit.
    TH = max(8, min(_round_up(tile_h, 8), _round_up(Ho, 8)))
    HT = pl.cdiv(Ho, TH)              # number of H tiles (2nd grid axis)
    thb = TH // 8                     # tile height in 8-row halo blocks
    n_hblk8 = pl.cdiv(H, 8)           # 8-row blocks along H (for clamping)

    kernel = _make_gc_kernel(C, TH, Wo)

    out = pl.pallas_call(
        kernel,
        out_shape=jax.ShapeDtypeStruct((N, 1, Ho, Wo), jnp.float32),
        grid=(N, HT),
        in_specs=[
            # Main block: input rows [h*TH, h*TH + TH).
            pl.BlockSpec((pl.Squeezed(), C, TH, W),
                         lambda n, h: (n, 0, h, 0)),
            # Halo block: 8 rows starting at (h+1)*TH, clamped in-bounds. Only
            # its first two rows are ever used, and only when they are real
            # rows of the image (the clamp only triggers when they are not).
            pl.BlockSpec((pl.Squeezed(), C, 8, W),
                         lambda n, h: (n, 0,
                                       jnp.minimum((h + 1) * thb, n_hblk8 - 1),
                                       0)),
        ],
        out_specs=pl.BlockSpec((pl.Squeezed(), pl.Squeezed(), TH, Wo),
                               lambda n, h: (n, 0, h, 0)),
        compiler_params=pltpu.CompilerParams(
            dimension_semantics=("parallel", "parallel"),
            vmem_limit_bytes=64 * 1024 * 1024),
    )(x, x)
    return out


def gc_loss(B, R, *, tile_h=256):
    """Pallas equivalent of GCLoss.forward(B, R).

    Two independent pallas_calls (launch overhead is ~µs); no concatenate, no
    pad, no post-kernel slice — zero extra HBM passes around the kernel.
    """
    return (sobel_tanhshrink(B, tile_h=tile_h),
            sobel_tanhshrink(R, tile_h=tile_h))


def _reference(x, C):
    """Independent pure-JAX reference (NCHW cross-correlation, VALID)."""
    sobel_x_2d = np.array([[1, 0, -1], [2, 0, -2], [1, 0, -1]], np.float32)
    sobel_y_2d = np.array([[1, 2, 1], [0, 0, 0], [-1, -2, -1]], np.float32)
    wx = jnp.asarray(np.tile(sobel_x_2d[None, None], (1, C, 1, 1)))
    wy = jnp.asarray(np.tile(sobel_y_2d[None, None], (1, C, 1, 1)))
    dn = lax.conv_dimension_numbers(x.shape, wx.shape, ("NCHW", "OIHW", "NCHW"))
    gx = lax.conv_general_dilated(x.astype(jnp.float32), wx, (1, 1), "VALID",
                                  dimension_numbers=dn,
                                  precision=lax.Precision.HIGHEST)
    gy = lax.conv_general_dilated(x.astype(jnp.float32), wy, (1, 1), "VALID",
                                  dimension_numbers=dn,
                                  precision=lax.Precision.HIGHEST)
    s = gx + gy
    return s - jnp.tanh(s)


if __name__ == "__main__":
    key = jax.random.PRNGKey(0)
    kb, kr, kb2, kr2 = jax.random.split(key, 4)

    # Test 1: module-like shapes (N=2, C=3, 16x16), default tiling.
    B = jax.random.normal(kb, (2, 3, 16, 16), dtype=jnp.float32)
    R = jax.random.normal(kr, (2, 3, 16, 16), dtype=jnp.float32)
    out_B, out_R = jax.jit(gc_loss)(B, R)
    out_B = jax.block_until_ready(out_B)
    out_R = jax.block_until_ready(out_R)
    assert out_B.shape == (2, 1, 14, 14) and out_R.shape == (2, 1, 14, 14)
    np.testing.assert_allclose(np.asarray(out_B), np.asarray(_reference(B, 3)),
                               rtol=1e-5, atol=1e-5)
    np.testing.assert_allclose(np.asarray(out_R), np.asarray(_reference(R, 3)),
                               rtol=1e-5, atol=1e-5)

    # Test 2: W not a multiple of 128, H that forces several (partial) H tiles,
    # exercising the halo fetch, the clamped halo index and partial blocks.
    B2 = jax.random.normal(kb2, (1, 3, 37, 200), dtype=jnp.float32)
    R2 = jax.random.normal(kr2, (1, 3, 37, 200), dtype=jnp.float32)
    out_B2, out_R2 = jax.jit(functools.partial(gc_loss, tile_h=16))(B2, R2)
    out_B2 = jax.block_until_ready(out_B2)
    out_R2 = jax.block_until_ready(out_R2)
    assert out_B2.shape == (1, 1, 35, 198) and out_R2.shape == (1, 1, 35, 198)
    np.testing.assert_allclose(np.asarray(out_B2), np.asarray(_reference(B2, 3)),
                               rtol=1e-5, atol=1e-5)
    np.testing.assert_allclose(np.asarray(out_R2), np.asarray(_reference(R2, 3)),
                               rtol=1e-5, atol=1e-5)

    print("KERNEL_OK")
</pallas_src>

<mosaic_0001>
module attributes {stable_mosaic.version = 11 : i64} {
  func.func @gc_kernel(%arg0: i32, %arg1: i32, %arg2: memref<1x3x16x16xf32, #tpu.memory_space<vmem>>, %arg3: memref<1x3x8x16xf32, #tpu.memory_space<vmem>>, %arg4: memref<1x1x16x14xf32, #tpu.memory_space<vmem>>) attributes {dimension_semantics = [#tpu.dimension_semantics<parallel>, #tpu.dimension_semantics<parallel>], iteration_bounds = array<i64: 2, 1>, scalar_prefetch = 0 : i64, scratch_operands = 0 : i64, tpu.core_type = #tpu.core_type<tc>, window_params = [{transform_indices = @transform_0, window_bounds = array<i64: 1, 3, 16, 16>}, {transform_indices = @transform_1, window_bounds = array<i64: 1, 3, 8, 16>}, {transform_indices = @transform_2, window_bounds = array<i64: 1, 1, 16, 14>}]} {
    %c0 = arith.constant 0 : index
    %c0_0 = arith.constant 0 : index
    %c0_1 = arith.constant 0 : index
    %c0_2 = arith.constant 0 : index
    %0 = vector.load %arg2[%c0, %c0_0, %c0_1, %c0_2] : memref<1x3x16x16xf32, #tpu.memory_space<vmem>>, vector<1x1x16x16xf32>
    %1 = vector.shape_cast %0 : vector<1x1x16x16xf32> to vector<16x16xf32>
    %c0_3 = arith.constant 0 : index
    %c0_4 = arith.constant 0 : index
    %c0_5 = arith.constant 0 : index
    %c0_6 = arith.constant 0 : index
    %2 = vector.load %arg3[%c0_3, %c0_4, %c0_5, %c0_6] : memref<1x3x8x16xf32, #tpu.memory_space<vmem>>, vector<1x1x8x16xf32>
    %3 = vector.shape_cast %2 : vector<1x1x8x16xf32> to vector<8x16xf32>
    %c0_7 = arith.constant 0 : index
    %c1 = arith.constant 1 : index
    %c0_8 = arith.constant 0 : index
    %c0_9 = arith.constant 0 : index
    %4 = vector.load %arg2[%c0_7, %c1, %c0_8, %c0_9] : memref<1x3x16x16xf32, #tpu.memory_space<vmem>>, vector<1x1x16x16xf32>
    %5 = vector.shape_cast %4 : vector<1x1x16x16xf32> to vector<16x16xf32>
    %6 = arith.addf %1, %5 : vector<16x16xf32>
    %c0_10 = arith.constant 0 : index
    %c1_11 = arith.constant 1 : index
    %c0_12 = arith.constant 0 : index
    %c0_13 = arith.constant 0 : index
    %7 = vector.load %arg3[%c0_10, %c1_11, %c0_12, %c0_13] : memref<1x3x8x16xf32, #tpu.memory_space<vmem>>, vector<1x1x8x16xf32>
    %8 = vector.shape_cast %7 : vector<1x1x8x16xf32> to vector<8x16xf32>
    %9 = arith.addf %3, %8 : vector<8x16xf32>
    %c0_14 = arith.constant 0 : index
    %c2 = arith.constant 2 : index
    %c0_15 = arith.constant 0 : index
    %c0_16 = arith.constant 0 : index
    %10 = vector.load %arg2[%c0_14, %c2, %c0_15, %c0_16] : memref<1x3x16x16xf32, #tpu.memory_space<vmem>>, vector<1x1x16x16xf32>
    %11 = vector.shape_cast %10 : vector<1x1x16x16xf32> to vector<16x16xf32>
    %12 = arith.addf %6, %11 : vector<16x16xf32>
    %c0_17 = arith.constant 0 : index
    %c2_18 = arith.constant 2 : index
    %c0_19 = arith.constant 0 : index
    %c0_20 = arith.constant 0 : index
    %13 = vector.load %arg3[%c0_17, %c2_18, %c0_19, %c0_20] : memref<1x3x8x16xf32, #tpu.memory_space<vmem>>, vector<1x1x8x16xf32>
    %14 = vector.shape_cast %13 : vector<1x1x8x16xf32> to vector<8x16xf32>
    %15 = arith.addf %9, %14 : vector<8x16xf32>
    %16 = tpu.concatenate %12, %15 in 0 : vector<16x16xf32>, vector<8x16xf32> -> vector<24x16xf32>
    %17 = vector.extract_strided_slice %16 {offsets = [0, 0], sizes = [16, 16], strides = [1, 1]} : vector<24x16xf32> to vector<16x16xf32>
    %18 = vector.extract_strided_slice %16 {offsets = [1, 0], sizes = [16, 16], strides = [1, 1]} : vector<24x16xf32> to vector<16x16xf32>
    %19 = arith.addf %17, %18 : vector<16x16xf32>
    %20 = vector.extract_strided_slice %16 {offsets = [0, 0], sizes = [16, 16], strides = [1, 1]} : vector<24x16xf32> to vector<16x16xf32>
    %21 = vector.extract_strided_slice %16 {offsets = [2, 0], sizes = [16, 16], strides = [1, 1]} : vector<24x16xf32> to vector<16x16xf32>
    %22 = arith.subf %20, %21 : vector<16x16xf32>
    %23 = vector.extract_strided_slice %16 {offsets = [1, 0], sizes = [16, 16], strides = [1, 1]} : vector<24x16xf32> to vector<16x16xf32>
    %24 = vector.extract_strided_slice %16 {offsets = [2, 0], sizes = [16, 16], strides = [1, 1]} : vector<24x16xf32> to vector<16x16xf32>
    %25 = arith.addf %23, %24 : vector<16x16xf32>
    %cst = arith.constant 0.000000e+00 : f32
    %26 = vector.broadcast %cst : f32 to vector<16x16xf32>
    %27 = arith.subf %26, %25 : vector<16x16xf32>
    %28 = vector.extract_strided_slice %19 {offsets = [0, 0], sizes = [16, 14], strides = [1, 1]} : vector<16x16xf32> to vector<16x14xf32>
    %29 = vector.extract_strided_slice %22 {offsets = [0, 1], sizes = [16, 14], strides = [1, 1]} : vector<16x16xf32> to vector<16x14xf32>
    %30 = arith.addf %28, %29 : vector<16x14xf32>
    %31 = vector.extract_strided_slice %27 {offsets = [0, 2], sizes = [16, 14], strides = [1, 1]} : vector<16x16xf32> to vector<16x14xf32>
    %32 = arith.addf %30, %31 : vector<16x14xf32>
    %cst_21 = arith.constant 2.000000e+00 : f32
    %33 = vector.broadcast %cst_21 : f32 to vector<16x14xf32>
    %34 = arith.mulf %33, %32 : vector<16x14xf32>
    %35 = math.tanh %34 : vector<16x14xf32>
    %36 = arith.subf %34, %35 : vector<16x14xf32>
    %c0_22 = arith.constant 0 : index
    %c0_23 = arith.constant 0 : index
    %c0_24 = arith.constant 0 : index
    %c0_25 = arith.constant 0 : index
    %37 = vector.load %arg4[%c0_22, %c0_23, %c0_24, %c0_25] : memref<1x1x16x14xf32, #tpu.memory_space<vmem>>, vector<1x1x16x14xf32>
    %38 = vector.shape_cast %37 : vector<1x1x16x14xf32> to vector<16x14xf32>
    %39 = vector.shape_cast %36 : vector<16x14xf32> to vector<1x1x16x14xf32>
    tpu.vector_store %arg4[%c0_22, %c0_23, %c0_24, %c0_25], %39 {strides = array<i32>} : memref<1x1x16x14xf32, #tpu.memory_space<vmem>>, vector<1x1x16x14xf32>,
    return
  }
  func.func @transform_0(%arg0: i32, %arg1: i32) -> (i32, i32, i32, i32) {
    %c0_i32 = arith.constant 0 : i32
    %c0_i32_0 = arith.constant 0 : i32
    %c0_i32_1 = arith.constant 0 : i32
    return %arg0, %c0_i32, %arg1, %c0_i32_0 : i32, i32, i32, i32
  }
  func.func @transform_1(%arg0: i32, %arg1: i32) -> (i32, i32, i32, i32) {
    %c1_i32 = arith.constant 1 : i32
    %0 = arith.addi %arg1, %c1_i32 : i32
    %c2_i32 = arith.constant 2 : i32
    %1 = arith.muli %0, %c2_i32 : i32
    %c1_i32_0 = arith.constant 1 : i32
    %2 = arith.minsi %1, %c1_i32_0 : i32
    %c0_i32 = arith.constant 0 : i32
    %c0_i32_1 = arith.constant 0 : i32
    %c0_i32_2 = arith.constant 0 : i32
    return %arg0, %c0_i32, %2, %c0_i32_1 : i32, i32, i32, i32
  }
  func.func @transform_2(%arg0: i32, %arg1: i32) -> (i32, i32, i32, i32) {
    %c0_i32 = arith.constant 0 : i32
    %c0_i32_0 = arith.constant 0 : i32
    %c0_i32_1 = arith.constant 0 : i32
    return %arg0, %c0_i32, %arg1, %c0_i32_0 : i32, i32, i32, i32
  }
}

</mosaic_0001>

<bundles_post_ra>
// kernel: gc_loss.2
= control target key start
LH: loop header
LB: loop body
LE: loop exit
PB: predicated region body
PF: predicated region fallthrough
CT: control target
= control target key end

     0   :  { %7 = vsyncpa [#allocation3], 0  ;;  %s798_s0 = inlined_call_operand.hbm [shape: f32[2,3,16,16], index: 0, kind: input, shape index: {}, may-alias: {0,1}]   ;;  %s799_s1 = inlined_call_operand.hbm [shape: f32[2,3,16,16], index: 1, kind: input, shape index: {}, may-alias: {0,1}]   ;;  %s800_s2 = inlined_call_operand.vmem [shape: f32[2,1,14,14], index: 2, kind: output, shape index: {}]  }
   0x1   :  { %9 = vsyncpa [#allocation3 + $0x1], 0 }
   0x2   :  { %10 = vsyncpa [#allocation5], 0 }
   0x3   :  { %12 = vsyncpa [#allocation5 + $0x1], 0  ;;  %s689_s9 = smov 0   ;;  %s691_s10 = smov 0  }
   0x4   :  { %s693_s11 = smov 0   ;;  %s695_s12 = smov 0  }
   0x5   :  { %s697_s13 = smov 0   ;;  %s699_s14 = smov 0  }
   0x6 LB: > { %s457_s15 = sadd.s32 4294967295, %s667_s14   ;;  %s30_s16 = sadd.s32 1, %s663_s13  ;;  %s667_s14 = sphi %s699_s14, %s18_s14   ;;  %s663_s13 = sphi %s697_s13, %s807_s13   ;;  %s659_s12 = sphi %s695_s12, %s806_s12   ;;  %s655_s11 = sphi %s693_s11, %s805_s11   ;;  %s651_s10 = sphi %s691_s10, %s804_s10   ;;  %s647_s9 = sphi %s689_s9, %s803_s9  }
   0x7   : > { %p32_p0 = scmp.ge.s32.totalorder %s30_s16, 2  ;;  %s39_s17 = sadd.s32 1, %s655_s11 }
   0x8   : > { %p46_p1 = scmp.ne.s32.totalorder %s655_s11, %s651_s10  ;;  %p47_p2 = scmp.eq.s32.totalorder %s667_s14, 0 }
   0x9   : > { %s809_s16 = smov (%p32_p0, %s30_s16), 0  ;;  %p52_p4 = scmp.ne.s32.totalorder %s651_s10, %s647_s9 }
   0xa   : > { %p48_p3 = por %p47_p2, %p46_p1  ;;  %s34_s18 = ssub.s32 %s663_s13, %s809_s16 }
   0xb   : > { %p53_p5 = scmp.eq.s32.totalorder %s457_s15, 0  ;;  %p37_p6 = scmp.eq.s32.totalorder %s34_s18, 0 }
   0xc   : > { %p494_p8 = scmp.lt.s32.totalorder %s667_s14, 2  ;;  %s737_s21 = sand.u32 1, %s655_s11  }
   0xd   : > { %p728_p7 = por %p53_p5, %p52_p4  ;;  %s478_s22 = smul.u32 48, %s663_s13 }
   0xe   : > { %s734_s20 = scalar_select %p37_p6, %s655_s11, %s39_s17  }
   0xf   : > { %s477_s23 = smul.u32 48, %s737_s21  ;;  %s151_s26 = scalar_lea.hbm %s798_s0, %s478_s22 }
  0x10   : > { %p744_p9 = pnand %p494_p8, %p48_p3  ;;  %s152_s28 = sshll.u32 %s151_s26, 4  ;;  %s153_s28 = int_to_ptr.hbm [resolvable:$true] %s152_s28 }
  0x11   : > { %s144_s29 = scalar_lea.vmem [#allocation2], %s477_s23  ;;  %s141_s3 = scalar_lea.sflag [#allocation3], %s737_s21 }
  0x12   : > { %s154_s30 = sshll.u32 %s144_s29, 4  ;;  %s669_s4 = smov 128   ;;  %s155_s30 = int_to_ptr.vmem [resolvable:$true] %s154_s30 }
  0x13   : > { %s670_s5 = smov 8   ;;  %p463_p10 = scmp.ge.s32.totalorder %s667_s14, 1 }
  0x14   : > { %490 = dma.hbm_to_vmem [thread:$0]  (!%p744_p9), %s153_s28, 768, %s155_s30, %s141_s3, %s669_s4, %s669_s4, %s670_s5  }
  0x15   : > { %p189_p11 = scmp.lt.s32.totalorder %s667_s14, 3  ;;  %s479_s6 = smul.u32 24, %s737_s21 }
  0x16   : > { %s475_s7 = sadd.s32 8, %s478_s22  ;;  %s165_s24 = scalar_lea.sflag [#allocation5], %s737_s21 }
  0x17   : > { %p190_p12 = pnand %p463_p10, %p189_p11  ;;  %s178_s15 = scalar_lea.hbm %s799_s1, %s475_s7 }
  0x18   : > { %s179_s17 = sshll.u32 %s178_s15, 4  ;;  %s168_s18 = scalar_lea.vmem [#allocation4], %s479_s6  ;;  %s180_s17 = int_to_ptr.hbm [resolvable:$true] %s179_s17 }
  0x19   : > { %s181_s23 = sshll.u32 %s168_s18, 4  ;;  %s671_s25 = smov 256   ;;  %s182_s23 = int_to_ptr.vmem [resolvable:$true] %s181_s23 }
  0x1a   : > { %493 = dma.hbm_to_vmem [thread:$0]  (!%p744_p9), %s180_s17, 384, %s182_s23, %s165_s24, %s671_s25, %s669_s4, %s670_s5  }
  0x1b   : > { %193 = sbr.rel (%p190_p12) target bundleno = 192 (0xc0), region = 28  ;;  %s195_s26 = sand.u32 (!%p190_p12), 1, %s651_s10  }
  0x1c   : > { %s481_s28 = smul.u32 (!%p190_p12), 48, %s195_s26  ;;  %s196_s22 = scalar_lea.sflag (!%p190_p12), [#allocation3], %s195_s26 }
  0x1e   : > { %s199_s29 = scalar_lea.vmem (!%p190_p12), [#allocation2], %s481_s28 }
  0x20   : > { %638 = dma.done.wait (%p728_p7), %s196_s22, 768  }
  0x21   : > { %640 = vsyncadd (%p728_p7), %s196_s22, 4294966528  ;;  %s482_s30 = smul.u32 24, %s195_s26  ;;  %s206_s3 = scalar_lea.sflag [#allocation5], %s195_s26 }
  0x23   : > { %s209_s6 = scalar_lea.vmem [#allocation4], %s482_s30 }
  0x24   : > { %642 = dma.done.wait (%p728_p7), %s206_s3, 384  }
  0x25   : > { %644 = vsyncadd (%p728_p7), %s206_s3, 4294966912  ;;  %v255_v0 = vld [vmem:[%s199_s29] sm:$0xff]  ;;  %v256_v1 = vld [vmem:[%s199_s29 + $0x8] sm:$0xff]  ;;  %vm287_vm0 = vcmask 1045504   ;;  %vm277_vm1 = vcmask 1046528   ;;  %s672_s19 = smov 127  }
  0x26   : > { %v466_v2 = vld [vmem:[%s199_s29 + $0x10] sm:$0xff]  ;;  %v467_v3 = vld [vmem:[%s199_s29 + $0x18] sm:$0xff]  ;;  %v469_v5 = vld [vmem:[%s199_s29 + $0x20] sm:$0xff]  ;;  %s673_s21 = smov 126   ;;  %p246_p13 = scmp.lt.s32.totalorder %s659_s12, 1  ;;  %vm334_vm2 = vcmask 113664  }
  0x27   : > { %v261_v4 = vadd.f32 %v466_v2, %v255_v0  ;;  %v470_v6 = vld [vmem:[%s199_s29 + $0x28] sm:$0xff]  ;;  %v262_v7 = vadd.f32 %v467_v3, %v256_v1  ;;  %v471_v10 = vld [vmem:[%s209_s6 + $0x10] sm:$0xff] }
  0x28   : > { %v257_v8 = vld [vmem:[%s209_s6] sm:$0xff]  ;;  %v468_v9 = vld [vmem:[%s209_s6 + $0x8] sm:$0xff]  ;;  %s811_s12 = smov (!%p246_p13, %s659_s12), 1 }
  0x29   : > { %v269_v11 = vadd.f32 %v469_v5, %v261_v4  ;;  %v265_v12 = vadd.f32 %v468_v9, %v257_v8  ;;  %v270_v13 = vadd.f32 %v470_v6, %v262_v7  ;;  %s476_s27 = sshll.u32 %s811_s12, 4 }
  0x2a   : > { %s253_s7 = scalar_lea.vmem %s800_s2, %s476_s27 }
  0x2b   : > { %v288_v14 = vrot.slane %v269_v11, 2  ;;  %v273_v15 = vadd.f32 %v471_v10, %v265_v12  ;;  %v278_v16 = vrot.slane %v269_v11, 1  ;;  %v289_v17 = vrot.slane %v270_v13, 2 }
  0x2c   : > { %v279_v18 = vrot.slane %v270_v13, 1 }
  0x2d   : > { %v281_v19 = vrot.slane %v273_v15, 1  ;;  %v290_v20 = vsel %vm287_vm0, %v288_v14, %v289_v17  ;;  %v291_v22 = vrot.slane %v273_v15, 2 }
  0x2e   : > { %v280_v21 = vsel %vm277_vm1, %v278_v16, %v279_v18  ;;  %v295_v23 = vsub.f32 %v269_v11, %v290_v20 }
  0x2f   : > { %v282_v24 = vsel %vm277_vm1, %v279_v18, %v281_v19  ;;  %v285_v25 = vadd.f32 %v280_v21, %v269_v11  ;;  %v298_v27 = vadd.f32 %v281_v19, %v273_v15  ;;  %v292_v30 = vsel %vm287_vm0, %v289_v17, %v291_v22 }
  0x30   : > { %v286_v26 = vadd.f32 %v282_v24, %v270_v13  ;;  %304 = vrot.lane.b32.xlu0 %v295_v23, %s672_s19  ;;  %v296_v34 = vsub.f32 %v270_v13, %v292_v30 }
  0x31   : > { %v299_v28 = vsub.f32 0.0, %v285_v25  ;;  %v301_v33 = vsub.f32 0.0, %v298_v27 }
  0x32   : > { %v300_v29 = vsub.f32 0.0, %v286_v26 }
  0x33   : > { %v315_v31 = vrot.slane %v299_v28, 1  ;;  %v318_v36 = vrot.slane %v301_v33, 1 }
  0x34   : > { %v316_v32 = vrot.slane %v300_v29, 1 }
  0x36   : > { %v317_v35 = vsel %vm277_vm1, %v315_v31, %v316_v32  ;;  %v319_v37 = vsel %vm277_vm1, %v316_v32, %v318_v36 }
  0x37   : > { %320 = vrot.lane.b32.xlu1 %v317_v35, %s673_s21 }
  0x38   : > { %306 = vrot.lane.b32.xlu0 %v296_v34, %s672_s19 }
  0x3f   : > { %322 = vrot.lane.b32.xlu1 %v319_v37, %s673_s21 }
  0xa2   : > { %v305_v38 = vpop.permute.xlu0 %304 }
  0xa3   : > { %v310_v39 = vadd.f32 %v305_v38, %v285_v25 }
  0xa9   : > { %v321_v40 = vpop.permute.xlu1 %320 }
  0xaa   : > { %v326_v41 = vadd.f32 %v321_v40, %v310_v39  ;;  %v307_v42 = vpop.permute.xlu0 %306 }
  0xab   : > { %v311_v44 = vadd.f32 %v307_v42, %v286_v26 }
  0xac   : > { %v328_v43 = vmul.f32 2.0, %v326_v41 }
  0xae   : > { %549 = vtanh.f32 %v328_v43 }
  0xb1   : > { %v323_v45 = vpop.permute.xlu1 %322 }
  0xb2   : > { %v327_v46 = vadd.f32 %v323_v45, %v311_v44 }
  0xb4   : > { %v550_v47 = vpop.eup %549  ;;  %v329_v48 = vmul.f32 2.0, %v327_v46 }
  0xb5   : > { %v332_v49 = vsub.f32 %v328_v43, %v550_v47 }
  0xb6   : > { %551 = vtanh.f32 %v329_v48 }
  0xb7   : > { %335 = vst.msk [vmem:[%s253_s7] sm:$0xff] %vm334_vm2, %v332_v49 }
  0xbc   : > { %v552_v50 = vpop.eup %551 }
  0xbd   : > { %v333_v51 = vsub.f32 %v329_v48, %v552_v50 }
  0xbf   : > { %336 = vst.msk [vmem:[%s253_s7 + $0x8] sm:$0xff] %vm334_vm2, %v333_v51 }
  0xc0 PF: > { %s18_s14 = sadd.s32 1, %s667_s14   ;;  %s803_s9 = smov %s651_s10 }
  0xc1   : > { %p15_p0 = scmp.ge.s32.totalorder %s18_s14, 4   ;;  %s804_s10 = smov %s655_s11 }
  0xc2   : > { %s805_s11 = smov %s734_s20  ;;  %s806_s12 = smov %s663_s13 }
  0xc3   : > { %s807_s13 = smov %s809_s16  ;;  %17 = sbr.rel (!%p15_p0) target bundleno = 6 (0x6), region = 85 }
  0xc8   :  { %367 = vsyncpa [#allocation3], 1 }
  0xc9   :  { %369 = vsyncpa [#allocation3 + $0x1], 1 }
  0xca   :  { %370 = vsyncpa [#allocation5], 1 }
  0xcb   :  { %372 = vsyncpa [#allocation5 + $0x1], 1 }

</bundles_post_ra>
